<compile_context>
chip_gen: v5e
topology: v5e:2x2
jax: 0.10.0
libtpu: 0.0.40
codegen_flags: <defaults>
</compile_context>

<pallas_src>
import functools

import jax
import jax.numpy as jnp
import numpy as np
from jax.experimental import pallas as pl
from jax.experimental.pallas import tpu as pltpu


def _round_up(x, m):
    return (x + m - 1) // m * m


def _choose_vocab_tiling(V):
    """Lane-dense vocab tiling: one wide tile for small/medium vocab, 512-lane
    streaming tiles for large vocab."""
    v128 = _round_up(V, 128)
    if v128 <= 1024:
        tile_v = v128
    else:
        tile_v = 512
    v_pad = _round_up(V, tile_v)
    return tile_v, v_pad, v_pad // tile_v


def decoder_kernel(token_ref, emb_hbm_ref, h_ref,
                   w_ih_ref, w_hh_ref, b_ih_ref, b_hh_ref,
                   w_out_ref, b_out_ref,
                   logp_ref, h_out_ref,
                   x_scratch, h_scratch):
    j = pl.program_id(0)
    H = h_ref.shape[1]

    # ---- single GRU step: run only on the first vocab tile ----
    @pl.when(j == 0)
    def _():
        tok = token_ref[0]
        # gather exactly one embedding row HBM -> VMEM (table never fully resident)
        pltpu.sync_copy(emb_hbm_ref.at[pl.ds(tok, 1), :], x_scratch)
        x = jnp.maximum(x_scratch[...], 0.0)              # relu(embedding(token)), (1, H)
        h = h_ref[...]                                    # (1, H)

        # fused gate matmuls (gate order r|z|n along the 3H output dim),
        # biases as in PyTorch: gi = x@W_ih^T + b_ih ; gh = h@W_hh^T + b_hh
        gi = jnp.dot(x, w_ih_ref[...],
                     preferred_element_type=jnp.float32) + b_ih_ref[...]   # (1, 3H)
        gh = jnp.dot(h, w_hh_ref[...],
                     preferred_element_type=jnp.float32) + b_hh_ref[...]   # (1, 3H)

        s_rz = gi[:, :2 * H] + gh[:, :2 * H]                               # (1, 2H)
        r = jax.nn.sigmoid(s_rz[:, :H])
        z = jax.nn.sigmoid(s_rz[:, H:])
        n = jnp.tanh(gi[:, 2 * H:] + r * gh[:, 2 * H:])
        h_new = (1.0 - z) * n + z * h                                      # (1, H)

        h_scratch[...] = h_new
        h_out_ref[...] = h_new

    # ---- vocab-tiled output projection (lane-dense tile) ----
    logits = jnp.dot(h_scratch[...], w_out_ref[...],
                     preferred_element_type=jnp.float32) + b_out_ref[...]  # (1, tile_v)
    logp_ref[pl.ds(j, 1), :] = logits    # row j of the (n_tiles, tile_v) resident output

    # ---- finalize: log-softmax over the whole padded vocab on the last tile ----
    @pl.when(j == pl.num_programs(0) - 1)
    def _():
        v = logp_ref[...]                                  # (n_tiles, tile_v)
        m = jnp.max(jnp.max(v, axis=1, keepdims=True), axis=0, keepdims=True)
        shifted = v - m
        lse = jnp.log(jnp.sum(jnp.sum(jnp.exp(shifted), axis=1, keepdims=True),
                              axis=0, keepdims=True))
        logp_ref[...] = shifted - lse


def init_decoder_params(key, num_outputs, hidden_size):
    """Deterministic parameter init matching the PyTorch module shapes."""
    V, H = num_outputs, hidden_size
    ks = jax.random.split(key, 7)
    s = 1.0 / np.sqrt(H)
    return {
        "embedding": jax.random.normal(ks[0], (V, H), jnp.float32),          # nn.Embedding
        "w_ih": jax.random.uniform(ks[1], (3 * H, H), jnp.float32, -s, s),   # GRU weight_ih_l0
        "w_hh": jax.random.uniform(ks[2], (3 * H, H), jnp.float32, -s, s),   # GRU weight_hh_l0
        "b_ih": jax.random.uniform(ks[3], (3 * H,), jnp.float32, -s, s),
        "b_hh": jax.random.uniform(ks[4], (3 * H,), jnp.float32, -s, s),
        "w_out": jax.random.uniform(ks[5], (V, H), jnp.float32, -s, s),      # Linear(H, V)
        "b_out": jax.random.uniform(ks[6], (V,), jnp.float32, -s, s),
    }


def prepare_decoder_params(params):
    """One-time kernel-friendly weight layout (run once, NOT per decode step)."""
    V, H = params["w_out"].shape
    tile_v, v_pad, n_tiles = _choose_vocab_tiling(V)

    w_out_t = jnp.zeros((H, v_pad), jnp.float32).at[:, :V].set(params["w_out"].T)
    b_out = jnp.full((1, v_pad), -1e30, jnp.float32).at[0, :V].set(params["b_out"])

    prep = {
        "embedding": params["embedding"],                           # (V, H), stays in HBM
        "w_ih_t": jnp.asarray(params["w_ih"].T, jnp.float32),       # (H, 3H), gates r|z|n
        "w_hh_t": jnp.asarray(params["w_hh"].T, jnp.float32),       # (H, 3H)
        "b_ih": params["b_ih"].reshape(1, 3 * H).astype(jnp.float32),
        "b_hh": params["b_hh"].reshape(1, 3 * H).astype(jnp.float32),
        "w_out_t": w_out_t,                                         # (H, v_pad), zero-padded
        "b_out": b_out,                                             # (1, v_pad), -1e30 pad
    }
    meta = dict(V=V, H=H, tile_v=tile_v, v_pad=v_pad, n_tiles=n_tiles)
    return prep, meta


@functools.partial(jax.jit, static_argnames=("V", "H", "tile_v", "v_pad", "n_tiles"))
def _decoder_call(prep, token, h0, *, V, H, tile_v, v_pad, n_tiles):
    grid_spec = pltpu.PrefetchScalarGridSpec(
        num_scalar_prefetch=1,                                       # token -> SMEM
        grid=(n_tiles,),
        in_specs=[
            pl.BlockSpec(memory_space=pl.ANY),                       # embedding (HBM)
            pl.BlockSpec((1, H), lambda j, tok: (0, 0)),             # hidden
            pl.BlockSpec((H, 3 * H), lambda j, tok: (0, 0)),         # w_ih_t (fused gates)
            pl.BlockSpec((H, 3 * H), lambda j, tok: (0, 0)),         # w_hh_t
            pl.BlockSpec((1, 3 * H), lambda j, tok: (0, 0)),         # b_ih
            pl.BlockSpec((1, 3 * H), lambda j, tok: (0, 0)),         # b_hh
            pl.BlockSpec((H, tile_v), lambda j, tok: (0, j)),        # w_out_t vocab tile
            pl.BlockSpec((1, tile_v), lambda j, tok: (0, j)),        # b_out vocab tile
        ],
        out_specs=(
            pl.BlockSpec((n_tiles, tile_v), lambda j, tok: (0, 0)),  # logp (VMEM-resident)
            pl.BlockSpec((1, H), lambda j, tok: (0, 0)),             # new hidden (resident)
        ),
        scratch_shapes=[
            pltpu.VMEM((1, H), jnp.float32),    # gathered embedding row
            pltpu.VMEM((1, H), jnp.float32),    # h_new, reused across vocab tiles
        ],
    )
    logp_pad, h_new = pl.pallas_call(
        decoder_kernel,
        out_shape=(
            jax.ShapeDtypeStruct((n_tiles, tile_v), jnp.float32),
            jax.ShapeDtypeStruct((1, H), jnp.float32),
        ),
        grid_spec=grid_spec,
        compiler_params=pltpu.CompilerParams(dimension_semantics=("arbitrary",)),
    )(token, prep["embedding"], h0,
      prep["w_ih_t"], prep["w_hh_t"], prep["b_ih"], prep["b_hh"],
      prep["w_out_t"], prep["b_out"])
    logp = logp_pad.reshape(1, v_pad)[:, :V]
    return logp, h_new


def decoder_forward(prep, meta, token, hidden):
    """token: int32 [1]; hidden: f32 [1,1,H]. Returns (logprobs [1,V], hidden [1,1,H])."""
    H = meta["H"]
    logp, h_new = _decoder_call(prep, token.astype(jnp.int32),
                                hidden.reshape(1, H), **meta)
    return logp, h_new.reshape(1, 1, H)


def decoder_forward_ref(params, token, hidden):
    """Pure-JAX reference (mirrors PyTorch GRU/LogSoftmax semantics)."""
    V, H = params["w_out"].shape
    x = jnp.maximum(params["embedding"][token[0]], 0.0).reshape(1, H)
    h = hidden.reshape(1, H)
    gi = x @ params["w_ih"].T + params["b_ih"]
    gh = h @ params["w_hh"].T + params["b_hh"]
    r = jax.nn.sigmoid(gi[:, :H] + gh[:, :H])
    z = jax.nn.sigmoid(gi[:, H:2 * H] + gh[:, H:2 * H])
    n = jnp.tanh(gi[:, 2 * H:] + r * gh[:, 2 * H:])
    h_new = (1.0 - z) * n + z * h
    logits = h_new @ params["w_out"].T + params["b_out"]
    return jax.nn.log_softmax(logits, axis=1), h_new.reshape(1, 1, H)


if __name__ == "__main__":
    key = jax.random.PRNGKey(0)

    # small config consistent with the module (single token, hidden=32, vocab=16)
    num_outputs, hidden_size = 16, 32
    params = init_decoder_params(key, num_outputs, hidden_size)
    prep, meta = prepare_decoder_params(params)

    token = jnp.array([3], dtype=jnp.int32)
    hidden = jnp.zeros((1, 1, hidden_size), dtype=jnp.float32)   # init_hidden()

    logp, h_new = decoder_forward(prep, meta, token, hidden)
    logp, h_new = jax.block_until_ready((logp, h_new))

    assert logp.shape == (1, num_outputs)
    assert h_new.shape == (1, 1, hidden_size)
    assert np.isfinite(np.asarray(logp)).all()
    assert abs(float(jnp.sum(jnp.exp(logp))) - 1.0) < 1e-3

    logp_r, h_r = decoder_forward_ref(params, token, hidden)
    np.testing.assert_allclose(np.asarray(logp), np.asarray(logp_r), atol=1e-4, rtol=1e-4)
    np.testing.assert_allclose(np.asarray(h_new), np.asarray(h_r), atol=1e-4, rtol=1e-4)

    # chain a second step (non-zero hidden exercises the recurrent path)
    token2 = jnp.array([7], dtype=jnp.int32)
    logp2, h_new2 = decoder_forward(prep, meta, token2, h_new)
    logp2, h_new2 = jax.block_until_ready((logp2, h_new2))
    logp2_r, h2_r = decoder_forward_ref(params, token2, h_r)
    np.testing.assert_allclose(np.asarray(logp2), np.asarray(logp2_r), atol=1e-4, rtol=1e-4)
    np.testing.assert_allclose(np.asarray(h_new2), np.asarray(h2_r), atol=1e-4, rtol=1e-4)

    # medium vocab: single wide lane-dense tile (padded 300 -> 512)
    num_outputs_b, hidden_b_sz = 300, 32
    params_b = init_decoder_params(jax.random.PRNGKey(1), num_outputs_b, hidden_b_sz)
    prep_b, meta_b = prepare_decoder_params(params_b)
    token_b = jnp.array([123], dtype=jnp.int32)
    hidden_b = jnp.zeros((1, 1, hidden_b_sz), dtype=jnp.float32)
    logp_b, h_b = decoder_forward(prep_b, meta_b, token_b, hidden_b)
    logp_b, h_b = jax.block_until_ready((logp_b, h_b))
    logp_b_r, h_b_r = decoder_forward_ref(params_b, token_b, hidden_b)
    np.testing.assert_allclose(np.asarray(logp_b), np.asarray(logp_b_r), atol=1e-4, rtol=1e-4)
    np.testing.assert_allclose(np.asarray(h_b), np.asarray(h_b_r), atol=1e-4, rtol=1e-4)

    # large vocab exercises the multi-tile (grid) output-projection + lse path
    num_outputs_c, hidden_c_sz = 3000, 32
    params_c = init_decoder_params(jax.random.PRNGKey(2), num_outputs_c, hidden_c_sz)
    prep_c, meta_c = prepare_decoder_params(params_c)
    assert meta_c["n_tiles"] > 1
    token_c = jnp.array([2345], dtype=jnp.int32)
    hidden_c = jnp.zeros((1, 1, hidden_c_sz), dtype=jnp.float32)
    logp_c, h_c = decoder_forward(prep_c, meta_c, token_c, hidden_c)
    logp_c, h_c = jax.block_until_ready((logp_c, h_c))
    logp_c_r, h_c_r = decoder_forward_ref(params_c, token_c, hidden_c)
    np.testing.assert_allclose(np.asarray(logp_c), np.asarray(logp_c_r), atol=1e-4, rtol=1e-4)
    np.testing.assert_allclose(np.asarray(h_c), np.asarray(h_c_r), atol=1e-4, rtol=1e-4)

    print("KERNEL_OK")
</pallas_src>

<mosaic_0001>
module attributes {stable_mosaic.version = 11 : i64} {
  func.func @decoder_kernel(%arg0: i32, %arg1: memref<1xi32, #tpu.memory_space<smem>>, %arg2: memref<16x32xf32, #tpu.memory_space<any>>, %arg3: memref<1x32xf32, #tpu.memory_space<vmem>>, %arg4: memref<32x96xf32, #tpu.memory_space<vmem>>, %arg5: memref<32x96xf32, #tpu.memory_space<vmem>>, %arg6: memref<1x96xf32, #tpu.memory_space<vmem>>, %arg7: memref<1x96xf32, #tpu.memory_space<vmem>>, %arg8: memref<32x128xf32, #tpu.memory_space<vmem>>, %arg9: memref<1x128xf32, #tpu.memory_space<vmem>>, %arg10: memref<1x128xf32, #tpu.memory_space<vmem>>, %arg11: memref<1x32xf32, #tpu.memory_space<vmem>>, %arg12: memref<1x32xf32, #tpu.memory_space<vmem>>, %arg13: memref<1x32xf32, #tpu.memory_space<vmem>>) attributes {dimension_semantics = [#tpu.dimension_semantics<arbitrary>], iteration_bounds = array<i64: 1>, scalar_prefetch = 1 : i64, scratch_operands = 2 : i64, tpu.core_type = #tpu.core_type<tc>, window_params = [{}, {pipeline_mode = #tpu.pipeline_mode<synchronous>, transform_indices = @transform_1, window_bounds = array<i64: 1, 32>}, {pipeline_mode = #tpu.pipeline_mode<synchronous>, transform_indices = @transform_2, window_bounds = array<i64: 32, 96>}, {pipeline_mode = #tpu.pipeline_mode<synchronous>, transform_indices = @transform_3, window_bounds = array<i64: 32, 96>}, {pipeline_mode = #tpu.pipeline_mode<synchronous>, transform_indices = @transform_4, window_bounds = array<i64: 1, 96>}, {pipeline_mode = #tpu.pipeline_mode<synchronous>, transform_indices = @transform_5, window_bounds = array<i64: 1, 96>}, {transform_indices = @transform_6, window_bounds = array<i64: 32, 128>}, {transform_indices = @transform_7, window_bounds = array<i64: 1, 128>}, {pipeline_mode = #tpu.pipeline_mode<synchronous>, transform_indices = @transform_8, window_bounds = array<i64: 1, 128>}, {pipeline_mode = #tpu.pipeline_mode<synchronous>, transform_indices = @transform_9, window_bounds = array<i64: 1, 32>}]} {
    %c0_i32 = arith.constant 0 : i32
    %0 = arith.cmpi eq, %arg0, %c0_i32 : i32
    %1 = arith.extui %0 : i1 to i32
    %c0_i32_0 = arith.constant 0 : i32
    %2 = arith.cmpi ne, %1, %c0_i32_0 : i32
    scf.if %2 {
      %c0_9 = arith.constant 0 : index
      %13 = memref.load %arg1[%c0_9] : memref<1xi32, #tpu.memory_space<smem>>
      "tpu.region"() ({
        %53 = tpu.sem_alloc : memref<!tpu.dma_semaphore, #tpu.memory_space<semaphore_mem>>
        %c0_i32_32 = arith.constant 0 : i32
        %54 = tpu.memref_slice %arg2[%13, %c0_i32_32] : memref<16x32xf32, #tpu.memory_space<any>> -> memref<1x32xf32, #tpu.memory_space<any>>
        tpu.enqueue_dma source(%54 : memref<1x32xf32, #tpu.memory_space<any>>) target(%arg12 : memref<1x32xf32, #tpu.memory_space<vmem>>) target_semaphore(%53 : memref<!tpu.dma_semaphore, #tpu.memory_space<semaphore_mem>>)
        %c0_i32_33 = arith.constant 0 : i32
        %55 = tpu.memref_slice %arg2[%13, %c0_i32_33] : memref<16x32xf32, #tpu.memory_space<any>> -> memref<1x32xf32, #tpu.memory_space<any>>
        tpu.wait_dma2 semaphore(%53 : memref<!tpu.dma_semaphore, #tpu.memory_space<semaphore_mem>>) src(%55 : memref<1x32xf32, #tpu.memory_space<any>>) dst(%arg12 : memref<1x32xf32, #tpu.memory_space<vmem>>)
        tpu.yield
      }) : () -> ()
      %c0_10 = arith.constant 0 : index
      %c0_11 = arith.constant 0 : index
      %14 = vector.load %arg12[%c0_10, %c0_11] : memref<1x32xf32, #tpu.memory_space<vmem>>, vector<1x32xf32>
      %cst_12 = arith.constant 0.000000e+00 : f32
      %15 = vector.broadcast %cst_12 : f32 to vector<1x32xf32>
      %16 = arith.maximumf %14, %15 : vector<1x32xf32>
      %c0_13 = arith.constant 0 : index
      %c0_14 = arith.constant 0 : index
      %17 = vector.load %arg3[%c0_13, %c0_14] : memref<1x32xf32, #tpu.memory_space<vmem>>, vector<1x32xf32>
      %c0_15 = arith.constant 0 : index
      %c0_16 = arith.constant 0 : index
      %18 = vector.load %arg4[%c0_15, %c0_16] : memref<32x96xf32, #tpu.memory_space<vmem>>, vector<32x96xf32>
      %cst_17 = arith.constant dense<0.000000e+00> : vector<1x96xf32>
      %19 = tpu.matmul %16, %18, %cst_17 {dimension_numbers = #tpu.dot_dimension_numbers<[1], [0], [0], [1], [0, 0, 1, 1], [], []>} : vector<1x32xf32>, vector<32x96xf32>, vector<1x96xf32> -> vector<1x96xf32>
      %c0_18 = arith.constant 0 : index
      %c0_19 = arith.constant 0 : index
      %20 = vector.load %arg6[%c0_18, %c0_19] : memref<1x96xf32, #tpu.memory_space<vmem>>, vector<1x96xf32>
      %21 = arith.addf %19, %20 : vector<1x96xf32>
      %c0_20 = arith.constant 0 : index
      %c0_21 = arith.constant 0 : index
      %22 = vector.load %arg5[%c0_20, %c0_21] : memref<32x96xf32, #tpu.memory_space<vmem>>, vector<32x96xf32>
      %cst_22 = arith.constant dense<0.000000e+00> : vector<1x96xf32>
      %23 = tpu.matmul %17, %22, %cst_22 {dimension_numbers = #tpu.dot_dimension_numbers<[1], [0], [0], [1], [0, 0, 1, 1], [], []>} : vector<1x32xf32>, vector<32x96xf32>, vector<1x96xf32> -> vector<1x96xf32>
      %c0_23 = arith.constant 0 : index
      %c0_24 = arith.constant 0 : index
      %24 = vector.load %arg7[%c0_23, %c0_24] : memref<1x96xf32, #tpu.memory_space<vmem>>, vector<1x96xf32>
      %25 = arith.addf %23, %24 : vector<1x96xf32>
      %26 = vector.extract_strided_slice %21 {offsets = [0, 0], sizes = [1, 64], strides = [1, 1]} : vector<1x96xf32> to vector<1x64xf32>
      %27 = vector.extract_strided_slice %25 {offsets = [0, 0], sizes = [1, 64], strides = [1, 1]} : vector<1x96xf32> to vector<1x64xf32>
      %28 = arith.addf %26, %27 : vector<1x64xf32>
      %29 = vector.extract_strided_slice %28 {offsets = [0, 0], sizes = [1, 32], strides = [1, 1]} : vector<1x64xf32> to vector<1x32xf32>
      %30 = arith.negf %29 : vector<1x32xf32>
      %31 = math.exp %30 : vector<1x32xf32>
      %cst_25 = arith.constant 1.000000e+00 : f32
      %32 = vector.broadcast %cst_25 : f32 to vector<1x32xf32>
      %33 = arith.addf %32, %31 : vector<1x32xf32>
      %34 = arith.divf %32, %33 : vector<1x32xf32>
      %35 = vector.extract_strided_slice %28 {offsets = [0, 32], sizes = [1, 32], strides = [1, 1]} : vector<1x64xf32> to vector<1x32xf32>
      %36 = arith.negf %35 : vector<1x32xf32>
      %37 = math.exp %36 : vector<1x32xf32>
      %cst_26 = arith.constant 1.000000e+00 : f32
      %38 = vector.broadcast %cst_26 : f32 to vector<1x32xf32>
      %39 = arith.addf %38, %37 : vector<1x32xf32>
      %40 = arith.divf %38, %39 : vector<1x32xf32>
      %41 = vector.extract_strided_slice %21 {offsets = [0, 64], sizes = [1, 32], strides = [1, 1]} : vector<1x96xf32> to vector<1x32xf32>
      %42 = vector.extract_strided_slice %25 {offsets = [0, 64], sizes = [1, 32], strides = [1, 1]} : vector<1x96xf32> to vector<1x32xf32>
      %43 = arith.mulf %34, %42 : vector<1x32xf32>
      %44 = arith.addf %41, %43 : vector<1x32xf32>
      %45 = math.tanh %44 : vector<1x32xf32>
      %cst_27 = arith.constant 1.000000e+00 : f32
      %46 = vector.broadcast %cst_27 : f32 to vector<1x32xf32>
      %47 = arith.subf %46, %40 : vector<1x32xf32>
      %48 = arith.mulf %47, %45 : vector<1x32xf32>
      %49 = arith.mulf %40, %17 : vector<1x32xf32>
      %50 = arith.addf %48, %49 : vector<1x32xf32>
      %c0_28 = arith.constant 0 : index
      %c0_29 = arith.constant 0 : index
      %51 = vector.load %arg13[%c0_28, %c0_29] : memref<1x32xf32, #tpu.memory_space<vmem>>, vector<1x32xf32>
      tpu.vector_store %arg13[%c0_28, %c0_29], %50 {strides = array<i32>} : memref<1x32xf32, #tpu.memory_space<vmem>>, vector<1x32xf32>,
      %c0_30 = arith.constant 0 : index
      %c0_31 = arith.constant 0 : index
      %52 = vector.load %arg11[%c0_30, %c0_31] : memref<1x32xf32, #tpu.memory_space<vmem>>, vector<1x32xf32>
      tpu.vector_store %arg11[%c0_30, %c0_31], %50 {strides = array<i32>} : memref<1x32xf32, #tpu.memory_space<vmem>>, vector<1x32xf32>,
    } else {
    }
    %c0 = arith.constant 0 : index
    %c0_1 = arith.constant 0 : index
    %3 = vector.load %arg13[%c0, %c0_1] : memref<1x32xf32, #tpu.memory_space<vmem>>, vector<1x32xf32>
    %c0_2 = arith.constant 0 : index
    %c0_3 = arith.constant 0 : index
    %4 = vector.load %arg8[%c0_2, %c0_3] : memref<32x128xf32, #tpu.memory_space<vmem>>, vector<32x128xf32>
    %cst = arith.constant dense<0.000000e+00> : vector<1x128xf32>
    %5 = tpu.matmul %3, %4, %cst {dimension_numbers = #tpu.dot_dimension_numbers<[1], [0], [0], [1], [0, 0, 1, 1], [], []>} : vector<1x32xf32>, vector<32x128xf32>, vector<1x128xf32> -> vector<1x128xf32>
    %c0_4 = arith.constant 0 : index
    %c0_5 = arith.constant 0 : index
    %6 = vector.load %arg9[%c0_4, %c0_5] : memref<1x128xf32, #tpu.memory_space<vmem>>, vector<1x128xf32>
    %7 = arith.addf %5, %6 : vector<1x128xf32>
    %8 = arith.index_cast %arg0 : i32 to index
    %c0_6 = arith.constant 0 : index
    %9 = vector.load %arg10[%8, %c0_6] : memref<1x128xf32, #tpu.memory_space<vmem>>, vector<1x128xf32>
    tpu.vector_store %arg10[%8, %c0_6], %7 {strides = array<i32>} : memref<1x128xf32, #tpu.memory_space<vmem>>, vector<1x128xf32>,
    %c0_i32_7 = arith.constant 0 : i32
    %10 = arith.cmpi eq, %arg0, %c0_i32_7 : i32
    %11 = arith.extui %10 : i1 to i32
    %c0_i32_8 = arith.constant 0 : i32
    %12 = arith.cmpi ne, %11, %c0_i32_8 : i32
    scf.if %12 {
      %c0_9 = arith.constant 0 : index
      %c0_10 = arith.constant 0 : index
      %13 = vector.load %arg10[%c0_9, %c0_10] : memref<1x128xf32, #tpu.memory_space<vmem>>, vector<1x128xf32>
      %cst_11 = arith.constant dense<0xFF800000> : vector<1xf32>
      %14 = vector.multi_reduction <maximumf>, %13, %cst_11 [1] : vector<1x128xf32> to vector<1xf32>
      %15 = vector.shape_cast %14 : vector<1xf32> to vector<1x1xf32>
      %cst_12 = arith.constant dense<0xFF800000> : vector<1xf32>
      %16 = vector.multi_reduction <maximumf>, %15, %cst_12 [0] : vector<1x1xf32> to vector<1xf32>
      %17 = vector.shape_cast %16 : vector<1xf32> to vector<1x1xf32>
      %18 = vector.broadcast %17 : vector<1x1xf32> to vector<1x128xf32>
      %19 = arith.subf %13, %18 : vector<1x128xf32>
      %20 = math.exp %19 : vector<1x128xf32>
      %cst_13 = arith.constant dense<0.000000e+00> : vector<1xf32>
      %21 = vector.multi_reduction <add>, %20, %cst_13 [1] : vector<1x128xf32> to vector<1xf32>
      %22 = vector.shape_cast %21 : vector<1xf32> to vector<1x1xf32>
      %cst_14 = arith.constant dense<0.000000e+00> : vector<1xf32>
      %23 = vector.multi_reduction <add>, %22, %cst_14 [0] : vector<1x1xf32> to vector<1xf32>
      %24 = vector.shape_cast %23 : vector<1xf32> to vector<1x1xf32>
      %25 = math.log %24 : vector<1x1xf32>
      %26 = vector.broadcast %25 : vector<1x1xf32> to vector<1x128xf32>
      %27 = arith.subf %19, %26 : vector<1x128xf32>
      %c0_15 = arith.constant 0 : index
      %c0_16 = arith.constant 0 : index
      %28 = vector.load %arg10[%c0_15, %c0_16] : memref<1x128xf32, #tpu.memory_space<vmem>>, vector<1x128xf32>
      tpu.vector_store %arg10[%c0_15, %c0_16], %27 {strides = array<i32>} : memref<1x128xf32, #tpu.memory_space<vmem>>, vector<1x128xf32>,
    } else {
    }
    return
  }
  func.func @transform_1(%arg0: i32, %arg1: memref<1xi32, #tpu.memory_space<smem>>) -> (i32, i32) {
    %c0_i32 = arith.constant 0 : i32
    %c0_i32_0 = arith.constant 0 : i32
    %c0_i32_1 = arith.constant 0 : i32
    return %c0_i32, %c0_i32_0 : i32, i32
  }
  func.func @transform_2(%arg0: i32, %arg1: memref<1xi32, #tpu.memory_space<smem>>) -> (i32, i32) {
    %c0_i32 = arith.constant 0 : i32
    %c0_i32_0 = arith.constant 0 : i32
    %c0_i32_1 = arith.constant 0 : i32
    return %c0_i32, %c0_i32_0 : i32, i32
  }
  func.func @transform_3(%arg0: i32, %arg1: memref<1xi32, #tpu.memory_space<smem>>) -> (i32, i32) {
    %c0_i32 = arith.constant 0 : i32
    %c0_i32_0 = arith.constant 0 : i32
    %c0_i32_1 = arith.constant 0 : i32
    return %c0_i32, %c0_i32_0 : i32, i32
  }
  func.func @transform_4(%arg0: i32, %arg1: memref<1xi32, #tpu.memory_space<smem>>) -> (i32, i32) {
    %c0_i32 = arith.constant 0 : i32
    %c0_i32_0 = arith.constant 0 : i32
    %c0_i32_1 = arith.constant 0 : i32
    return %c0_i32, %c0_i32_0 : i32, i32
  }
  func.func @transform_5(%arg0: i32, %arg1: memref<1xi32, #tpu.memory_space<smem>>) -> (i32, i32) {
    %c0_i32 = arith.constant 0 : i32
    %c0_i32_0 = arith.constant 0 : i32
    %c0_i32_1 = arith.constant 0 : i32
    return %c0_i32, %c0_i32_0 : i32, i32
  }
  func.func @transform_6(%arg0: i32, %arg1: memref<1xi32, #tpu.memory_space<smem>>) -> (i32, i32) {
    %c0_i32 = arith.constant 0 : i32
    %c0_i32_0 = arith.constant 0 : i32
    return %c0_i32, %arg0 : i32, i32
  }
  func.func @transform_7(%arg0: i32, %arg1: memref<1xi32, #tpu.memory_space<smem>>) -> (i32, i32) {
    %c0_i32 = arith.constant 0 : i32
    %c0_i32_0 = arith.constant 0 : i32
    return %c0_i32, %arg0 : i32, i32
  }
  func.func @transform_8(%arg0: i32, %arg1: memref<1xi32, #tpu.memory_space<smem>>) -> (i32, i32) {
    %c0_i32 = arith.constant 0 : i32
    %c0_i32_0 = arith.constant 0 : i32
    %c0_i32_1 = arith.constant 0 : i32
    return %c0_i32, %c0_i32_0 : i32, i32
  }
  func.func @transform_9(%arg0: i32, %arg1: memref<1xi32, #tpu.memory_space<smem>>) -> (i32, i32) {
    %c0_i32 = arith.constant 0 : i32
    %c0_i32_0 = arith.constant 0 : i32
    %c0_i32_1 = arith.constant 0 : i32
    return %c0_i32, %c0_i32_0 : i32, i32
  }
}

</mosaic_0001>

<bundles_post_ra>
// kernel: _decoder_call.1
= control target key start
LH: loop header
LB: loop body
LE: loop exit
PB: predicated region body
PF: predicated region fallthrough
CT: control target
= control target key end

     0   :  { %17 = vsyncpa [#allocation7], 0  ;;  %s631_s0 = inlined_call_operand.<no memory space> [shape: s32[1], index: 0, kind: input, shape index: {}]   ;;  %s632_s1 = inlined_call_operand.hbm [shape: f32[16,32], index: 1, kind: input, shape index: {}]   ;;  %s633_s2 = inlined_call_operand.vmem [shape: f32[1,32], index: 2, kind: input, shape index: {}]   ;;  %s634_s3 = inlined_call_operand.hbm [shape: f32[32,96], index: 3, kind: input, shape index: {}]   ;;  %s635_s4 = inlined_call_operand.hbm [shape: f32[32,96], index: 4, kind: input, shape index: {}]   ;;  %s636_s5 = inlined_call_operand.vmem [shape: f32[1,96], index: 5, kind: input, shape index: {}]   ;;  %s637_s6 = inlined_call_operand.hbm [shape: f32[1,96], index: 6, kind: input, shape index: {}]   ;;  %s638_s7 = inlined_call_operand.hbm [shape: f32[32,128], index: 7, kind: input, shape index: {}]   ;;  %s639_s8 = inlined_call_operand.vmem [shape: f32[1,128], index: 8, kind: input, shape index: {}]   ;;  %s640_s9 = inlined_call_operand.hbm [shape: f32[1,128], index: 9, kind: output, shape index: {0}]   ;;  %s641_s10 = inlined_call_operand.hbm [shape: f32[1,32], index: 10, kind: output, shape index: {1}]  }
   0x1   :  { %18 = vsyncpa [#allocation10], 0 }
   0x2   :  { %19 = vsyncpa [#allocation13], 0 }
   0x3   :  { %20 = vsyncpa [#allocation8], 0 }
   0x4   :  { %21 = vsyncpa [#allocation16], 0  ;;  %s41_s15 = sshll.u32 %s635_s4, 4  ;;  %s519_s16 = smov [#allocation9]   ;;  %s42_s15 = int_to_ptr.hbm [resolvable:$true] %s41_s15 }
   0x5   :  { %s43_s17 = sshll.u32 %s519_s16, 4  ;;  %s28_s20 = sshll.u32 %s634_s3, 4  ;;  %s44_s17 = int_to_ptr.vmem [resolvable:$true] %s43_s17  ;;  %s29_s20 = int_to_ptr.hbm [resolvable:$true] %s28_s20 }
   0x6   :  { %s520_s21 = smov 128   ;;  %s521_s22 = smov 8  }
   0x7   :  { %49 = dma.hbm_to_vmem [thread:$0]  %s42_s15, 512, %s44_s17, [#allocation10], %s520_s21, %s520_s21, %s521_s22  }
   0x8   :  { %s522_s23 = smov [#allocation6]   ;;  %s57_s27 = sshll.u32 %s637_s6, 4  ;;  %s58_s27 = int_to_ptr.hbm [resolvable:$true] %s57_s27 }
   0x9   :  { %s30_s24 = sshll.u32 %s522_s23, 4  ;;  %s67_s29 = sshll.u32 %s638_s7, 4  ;;  %s31_s24 = int_to_ptr.vmem [resolvable:$true] %s30_s24  ;;  %s68_s29 = int_to_ptr.hbm [resolvable:$true] %s67_s29 }
   0xa   :  { %36 = dma.hbm_to_vmem [thread:$0]  %s29_s20, 512, %s31_s24, [#allocation7], %s520_s21, %s520_s21, %s521_s22  }
   0xb   :  { %s523_s30 = smov [#allocation11]   ;;  %s524_s3 = smov [#allocation12]  }
   0xc   :  { %s59_s11 = sshll.u32 %s523_s30, 4  ;;  %s69_s12 = sshll.u32 %s524_s3, 4  ;;  %s60_s11 = int_to_ptr.vmem [resolvable:$true] %s59_s11  ;;  %s70_s12 = int_to_ptr.vmem [resolvable:$true] %s69_s12 }
   0xd   :  { %62 = dma.hbm_to_vmem [thread:$0]  %s58_s27, 16, %s60_s11, [#allocation10]  }
   0xe   :  { %75 = dma.hbm_to_vmem [thread:$0]  %s68_s29, 512, %s70_s12, [#allocation13], %s520_s21, %s520_s21, %s521_s22  }
   0xf   :  { %507 = dma.done.wait [#allocation7], 512  }
  0x10   :  { %508 = vsyncadd [#allocation7], 4294966784 }
  0x11   :  { %509 = dma.done.wait [#allocation10], 528  }
  0x12   :  { %510 = vsyncadd [#allocation10], 4294966768 }
  0x13   :  { %511 = dma.done.wait [#allocation13], 512  }
  0x14   :  { %512 = vsyncadd [#allocation13], 4294966784 }
  0x15   :  { %s99_s15 = scalar_lea.hbm %s632_s1, %s631_s0  ;;  %s525_s17 = smov [#allocation2]  }
  0x16   :  { %s107_s16 = sshll.u32 %s99_s15, 4  ;;  %s109_s18 = sshll.u32 %s525_s17, 4  ;;  %s108_s16 = int_to_ptr.hbm [resolvable:$true] %s107_s16  ;;  %s110_s18 = int_to_ptr.vmem [resolvable:$true] %s109_s18 }
  0x17   :  { %s435_s19 = sshra.s32 %s108_s16, 4  ;;  %s439_s23 = scalar_lea.hbm %s632_s1, 16  ;;  %s436_s19 = int_to_ptr.hbm [resolvable:$true] %s435_s19 }
  0x18   :  { %s437_s20 = scalar_lea.hbm %s436_s19, 1  ;;  %p440_p1 = scmp.lt.s32.totalorder %s436_s19, %s632_s1 }
  0x19   :  { %p438_p0 = scmp.ne.s32.totalorder %s436_s19, %s437_s20  ;;  %p441_p2 = scmp.lt.s32.totalorder %s439_s23, %s437_s20 }
  0x1b   :  { %p442_p3 = por %p441_p2, %p440_p1 }
  0x1d   :  { %p443_p4 = pnand %p442_p3, %p438_p0 }
  0x1f   :  { %446 = shalt.err (!%p443_p4)  }
  0x20   :  { %112 = dma.hbm_to_vmem [thread:$0]  %s108_s16, 16, %s110_s18, [#allocation17] }
  0x21   :  { %513 = dma.done.wait [#allocation17], 16 }
  0x22   :  { %514 = vsyncadd [#allocation17], 4294967280  ;;  %v122_v0 = vld [vmem:[#allocation6 + $0x18] sm:$0xff]  ;;  %v121_v2 = vld [vmem:[#allocation6 + $0x10] sm:$0xff]  ;;  %vm124_vm0 = vcmask 261120   ;;  %s526_s26 = smov 64  }
  0x23   :  { %v151_v1 = vld [vmem:[#allocation9 + $0x18] sm:$0xff]  ;;  %140 = vmatpush.msra.mxu0 %v122_v0  ;;  %v150_v3 = vld [vmem:[#allocation9 + $0x10] sm:$0xff]  ;;  %v120_v4 = vld [vmem:[#allocation6 + $0x8] sm:$0xff]  ;;  %s528_s30 = smov 32   ;;  %vm223_vm5 = vcmask 253952   ;;  %vm261_vm6 = vcmask 1040384  }
  0x24   :  { %168 = vmatpush.msra.mxu1 %v151_v1  ;;  %v149_v5 = vld [vmem:[#allocation9 + $0x8] sm:$0xff]  ;;  %v116_v6 = vld [vmem:[#allocation2] sm:$0x1]  ;;  %v119_v7 = vld [vmem:[#allocation6] sm:$0xff]  ;;  %s529_s3 = smov [#allocation15]   ;;  %s530_s14 = smov [#allocation14]  }
  0x25   :  { %141 = vmatpush.msra.mxu0 %v121_v2  ;;  %v148_v8 = vld [vmem:[#allocation9] sm:$0xff]  ;;  %v117_v9 = vmax.f32 %v116_v6, 0.0  ;;  %v118_v10 = vld [vmem:[%s633_s2] sm:$0x1]  ;;  %v229_v44 = vld [vmem:[#allocation12 + $0x10] sm:$0xff]  ;;  %s292_s12 = sshll.u32 %s529_s3, 4  ;;  %s293_s12 = int_to_ptr.vmem [resolvable:$true] %s292_s12 }
  0x26   :  { %169 = vmatpush.msra.mxu1 %v150_v3  ;;  %v152_v11 = vld [vmem:[#allocation11] sm:$0x1]  ;;  %v123_v14 = vld [vmem:[%s636_s5] sm:$0x1]  ;;  %s527_s5 = smov 96   ;;  %v228_v45 = vld [vmem:[#allocation12 + $0x8] sm:$0xff] }
  0x27   :  { %142 = vmatpush.msra.mxu0 %v120_v4  ;;  %v328_v36 = vld [vmem:[%s633_s2] ss:$0 sm:$0xff]  ;;  %v227_v46 = vld [vmem:[#allocation12] sm:$0xff]  ;;  %s281_s7 = sshll.u32 %s530_s14, 4  ;;  %s283_s17 = sshll.u32 %s640_s9, 4  ;;  %s282_s7 = int_to_ptr.vmem [resolvable:$true] %s281_s7  ;;  %s284_s17 = int_to_ptr.hbm [resolvable:$true] %s283_s17 }
  0x28   :  { %170 = vmatpush.msra.mxu1 %v149_v5  ;;  %v230_v43 = vld [vmem:[#allocation12 + $0x18] sm:$0xff] }
  0x29   :  { %143 = vmatpush.msra.mxu0 %v119_v7  ;;  %248 = vmatpush.msra.mxu2 %v230_v43  ;;  %v231_v49 = vld [vmem:[%s639_s8] sm:$0x1]  ;;  %s294_s8 = sshll.u32 %s641_s10, 4  ;;  %s295_s8 = int_to_ptr.hbm [resolvable:$true] %s294_s8 }
  0x2a   :  { %171 = vmatpush.msra.mxu1 %v148_v8  ;;  %312 = vmatmul.msk.f32.vlgmr.msra.gmra.mxu0 %vm124_vm0, %v117_v9 }
  0x2b   :  { %313 = vmatmul.msk.f32.vlgmr.msra.gmra.mxu1 %vm124_vm0, %v118_v10  ;;  %249 = vmatpush.msra.mxu2 %v229_v44 }
  0x2d   :  { %250 = vmatpush.msra.mxu2 %v228_v45 }
  0x2f   :  { %251 = vmatpush.msra.mxu2 %v227_v46 }
  0xa7   :  { %v145_v15 = vpop.f32.mrf.mxu0 }
  0xa8   :  { %v173_v12 = vpop.f32.mrf.mxu1  ;;  %v146_v16 = vadd.f32 %v145_v15, %v123_v14 }
  0xa9   :  { %v174_v13 = vadd.f32 %v173_v12, %v152_v11 }
  0xab   :  { %197 = vrot.lane.b32.xlu0 %v174_v13, %s526_s26  ;;  %v176_v17 = vadd.f32 %v174_v13, %v146_v16 }
  0xad   :  { %v314_v18 = vmul.f32 -1.442695, %v176_v17 }
  0xaf   :  { %329 = vpow2.f32 %v314_v18 }
  0xb5   :  { %v330_v19 = vpop.eup %329 }
  0xb6   :  { %v180_v20 = vadd.f32 1.0, %v330_v19 }
  0xb8   :  { %331 = vrcp.f32 %v180_v20  ;;  %v192_v26 = vand.u32 2147483648, %v180_v20  ;;  %vm186_vm2 = vweird.f32 %v180_v20  ;;  %v190_v27 = vand.u32 2147483647, %v180_v20 }
  0xba   :  { %v193_v29 = vor.u32 1.1754944e-38, %v192_v26  ;;  %vm191_vm4 = vcmp.eq.f32.partialorder %v190_v27, 8.507059e+37 }
  0xbe   :  { %v332_v21 = vpop.eup %331 }
  0xbf   :  { %v182_v22 = vmul.f32 %v332_v21, %v180_v20  ;;  %vm187_vm1 = vweird.f32 %v332_v21 }
  0xc0   :  { %vm188_vm3 = vmor %vm186_vm2, %vm187_vm1 }
  0xc1   :  { %v183_v23 = vsub.f32 1.0, %v182_v22 }
  0xc3   :  { %v184_v24 = vmul.f32 %v332_v21, %v183_v23 }
  0xc5   :  { %v185_v25 = vadd.f32 %v332_v21, %v184_v24 }
  0xc7   :  { %v189_v28 = vsel %vm188_vm3, %v332_v21, %v185_v25 }
  0xc8   :  { %v194_v31 = vsel %vm191_vm4, %v193_v29, %v189_v28 }
  0xc9   :  { %v207_v38 = vsub.f32 1.0, %v194_v31 }
 0x11d   :  { %v198_v30 = vpop.permute.xlu0 %197 }
 0x11e   :  { %v200_v32 = vmul.f32 %v198_v30, %v194_v31 }
 0x120   :  { %202 = vrot.lane.b32.xlu0 %v200_v32, %s526_s26 }
 0x192   :  { %v203_v33 = vpop.permute.xlu0 %202 }
 0x193   :  { %v205_v34 = vadd.f32 %v203_v33, %v146_v16 }
 0x195   :  { %333 = vtanh.f32 %v205_v34 }
 0x19b   :  { %v334_v35 = vpop.eup %333 }
 0x19c   :  { %209 = vrot.lane.b32.xlu1 %v334_v35, %s527_s5 }
 0x1a4   :  { %214 = vrot.lane.b32.xlu1 %v328_v36, %s528_s30 }
 0x20e   :  { %v210_v37 = vpop.permute.xlu1 %209 }
 0x20f   :  { %v212_v40 = vmul.f32 %v210_v37, %v207_v38 }
 0x216   :  { %v215_v39 = vpop.permute.xlu1 %214 }
 0x217   :  { %v217_v41 = vmul.f32 %v215_v39, %v194_v31 }
 0x219   :  { %v218_v42 = vadd.f32 %v217_v41, %v212_v40 }
 0x21b   :  { %220 = vrot.lane.b32.xlu2 %v218_v42, %s527_s5 }
 0x275   :  { %v221_v47 = vpop.permute.xlu2 %220 }
 0x276   :  { %224 = vst.msk [vmem:[#allocation3] sm:$0x1] %vm223_vm5, %v221_v47 }
 0x277   :  { %225 = vst.msk [vmem:[#allocation15] sm:$0x1] %vm223_vm5, %v221_v47 }
 0x278   :  { %297 = dma.vmem_to_hbm [thread:$0]  %s293_s12, 16, %s295_s8, [#allocation16]  }
 0x27d   :  { %v226_v48 = vld [vmem:[#allocation3] sm:$0x1] }
 0x27e   :  { %315 = vmatmul.msk.f32.vlgmr.msra.gmra.mxu2 %vm124_vm0, %v226_v48 }
 0x301   :  { %v253_v50 = vpop.f32.mrf.mxu2 }
 0x302   :  { %v254_v51 = vadd.f32 %v253_v50, %v231_v49 }
 0x304   :  { %256 = vst [vmem:[#allocation14] sm:$0x1] %v254_v51 }
 0x30b   :  { %v260_v52 = vld [vmem:[#allocation14] sm:$0x1] }
 0x30c   :  { %v262_v53 = vsel %vm261_vm6, %v260_v52, -inf }
 0x30d   :  { %263 = vmax.xlane.f32.xlu2 %v262_v53 }
 0x380   :  { %v264_v54 = vpop.xlane.xlu2 %263 }
 0x381   :  { %v265_v55 = vsub.f32 %v260_v52, %v264_v54 }
 0x383   :  { %v266_v56 = vmul.f32 1.442695, %v265_v55 }
 0x385   :  { %335 = vpow2.f32 %v266_v56 }
 0x38b   :  { %v336_v57 = vpop.eup %335 }
 0x38c   :  { %v268_v58 = vsel %vm261_vm6, %v336_v57, 0.0 }
 0x38d   :  { %269 = vadd.xlane.f32.xlu0 %v268_v58 }
 0x400   :  { %v270_v59 = vpop.xlane.xlu0 %269 }
 0x401   :  { %337 = vlog2.f32 %v270_v59 }
 0x407   :  { %v338_v60 = vpop.eup %337 }
 0x408   :  { %v273_v61 = vmul.f32 0.6931472, %v338_v60 }
 0x40a   :  { %v274_v62 = vsub.f32 %v265_v55, %v273_v61 }
 0x40c   :  { %275 = vst [vmem:[#allocation14] sm:$0x1] %v274_v62 }
 0x40d   :  { %286 = dma.vmem_to_hbm [thread:$0]  %s282_s7, 16, %s284_s17, [#allocation8]  }
 0x40e   :  { %515 = dma.done.wait [#allocation8], 16  }
 0x40f   :  { %516 = vsyncadd [#allocation8], 4294967280 }
 0x410   :  { %517 = dma.done.wait [#allocation16], 16  }
 0x411   :  { %518 = vsyncadd [#allocation16], 4294967280 }
 0x412   :  { %306 = vsyncpa [#allocation7], 1 }
 0x413   :  { %307 = vsyncpa [#allocation10], 1 }
 0x414   :  { %308 = vsyncpa [#allocation13], 1 }
 0x415   :  { %309 = vsyncpa [#allocation8], 1 }
 0x416   :  { %310 = vsyncpa [#allocation16], 1 }

</bundles_post_ra>
